<compile_context>
chip_gen: v6e
topology: v6e:2x2x1
jax: 0.10.0
libtpu: 0.0.40
codegen_flags: <defaults>
</compile_context>

<pallas_src>
import math
import functools

import jax
import jax.numpy as jnp
from jax.experimental import pallas as pl
from jax.experimental.pallas import tpu as pltpu

NEG_INF = -1e9   # finite stand-in for PyTorch's -inf masking (same softmax result)


def _vmem_limit_bytes():
    """~3/4 of physical VMEM: 96 MiB on v5e/v6e (128 MiB), 48 MiB on v7x (64 MiB)."""
    try:
        cap = int(pltpu.get_tpu_info().vmem_capacity_bytes)
        return int(min(cap * 3 // 4, 100 * 1024 * 1024))
    except Exception:
        return 48 * 1024 * 1024


VMEM_LIMIT = _vmem_limit_bytes()


# ---------------------------- tile helpers ----------------------------

def _tile(dim, pref):
    """Largest MXU/DMA-friendly tile <= pref that divides dim, else the full dim."""
    for t in (pref, 1024, 512, 256, 128):
        if t <= dim and dim % t == 0:
            return t
    return dim


def _attn_tile(L, pref=256):
    for t in (pref, 512, 256, 128):
        if t <= L and L % t == 0:
            return t
    return L


# ---------------------------- Pallas kernels ----------------------------

def _matmul_kernel(x_ref, w_ref, b_ref, o_ref, acc_ref):
    """Tiled matmul (bf16 MXU, f32 acc) with K-reduction; bias fused in the last-k epilogue."""
    k = pl.program_id(2)

    @pl.when(k == 0)
    def _():
        acc_ref[...] = jnp.zeros_like(acc_ref)

    acc_ref[...] += jnp.dot(x_ref[...].astype(jnp.bfloat16), w_ref[...],
                            preferred_element_type=jnp.float32)

    @pl.when(k == pl.num_programs(2) - 1)
    def _():
        o_ref[...] = (acc_ref[...] + b_ref[...]).astype(o_ref.dtype)


def _fused_proj_kernel(*refs, n_out):
    """x @ w_i + b_i for several weights sharing one x block (fused QKV / KV projections)."""
    x_ref = refs[0]
    w_refs = refs[1:1 + n_out]
    b_refs = refs[1 + n_out:1 + 2 * n_out]
    o_refs = refs[1 + 2 * n_out:1 + 3 * n_out]
    acc_refs = refs[1 + 3 * n_out:]

    kk = pl.program_id(2)

    @pl.when(kk == 0)
    def _():
        for acc in acc_refs:
            acc[...] = jnp.zeros_like(acc)

    x = x_ref[...].astype(jnp.bfloat16)
    for w, acc in zip(w_refs, acc_refs):
        acc[...] += jnp.dot(x, w[...], preferred_element_type=jnp.float32)

    @pl.when(kk == pl.num_programs(2) - 1)
    def _():
        for acc, b, o in zip(acc_refs, b_refs, o_refs):
            o[...] = (acc[...] + b[...]).astype(o.dtype)


def _matmul_res_ln_kernel(x_ref, w_ref, b_ref, r_ref, g_ref, beta_ref, o_ref, acc_ref):
    """Matmul with K-reduction; epilogue fuses bias + residual add + LayerNorm (eps=1e-5)."""
    k = pl.program_id(1)

    @pl.when(k == 0)
    def _():
        acc_ref[...] = jnp.zeros_like(acc_ref)

    acc_ref[...] += jnp.dot(x_ref[...].astype(jnp.bfloat16), w_ref[...],
                            preferred_element_type=jnp.float32)

    @pl.when(k == pl.num_programs(1) - 1)
    def _():
        h = acc_ref[...] + b_ref[...] + r_ref[...]
        mu = jnp.mean(h, axis=-1, keepdims=True)
        var = jnp.mean(jnp.square(h - mu), axis=-1, keepdims=True)
        o_ref[...] = ((h - mu) * jax.lax.rsqrt(var + 1e-5) * g_ref[...]
                      + beta_ref[...]).astype(o_ref.dtype)


def _ffn_res_ln_kernel(x_ref, w1_ref, b1_ref, w2_ref, b2_ref, g_ref, beta_ref, o_ref):
    """Fused FFN: LayerNorm(x + W2 relu(W1 x + b1) + b2); hidden activation never leaves VMEM."""
    x = x_ref[...].astype(jnp.bfloat16)
    h = jnp.dot(x, w1_ref[...], preferred_element_type=jnp.float32) + b1_ref[...]
    h = jnp.maximum(h, 0.0).astype(jnp.bfloat16)
    y = jnp.dot(h, w2_ref[...], preferred_element_type=jnp.float32) + b2_ref[...] + x_ref[...]
    mu = jnp.mean(y, axis=-1, keepdims=True)
    var = jnp.mean(jnp.square(y - mu), axis=-1, keepdims=True)
    o_ref[...] = ((y - mu) * jax.lax.rsqrt(var + 1e-5) * g_ref[...]
                  + beta_ref[...]).astype(o_ref.dtype)


def _layernorm_kernel(x_ref, g_ref, b_ref, o_ref):
    h = x_ref[...]
    mu = jnp.mean(h, axis=-1, keepdims=True)
    var = jnp.mean(jnp.square(h - mu), axis=-1, keepdims=True)
    o_ref[...] = (h - mu) * jax.lax.rsqrt(var + 1e-5) * g_ref[...] + b_ref[...]


def _flash_attn_kernel(*refs, H, Dh, scale, has_mask):
    """Flash-style multi-head attention over KV tiles (online softmax, lane-packed heads)."""
    if has_mask:
        q_ref, k_ref, v_ref, mask_ref, pad_ref, o_ref, m_ref, l_ref, acc_ref = refs
    else:
        q_ref, k_ref, v_ref, pad_ref, o_ref, m_ref, l_ref, acc_ref = refs
        mask_ref = None

    ki = pl.program_id(2)

    @pl.when(ki == 0)
    def _():
        m_ref[...] = jnp.full_like(m_ref, -jnp.inf)
        l_ref[...] = jnp.zeros_like(l_ref)
        acc_ref[...] = jnp.zeros_like(acc_ref)

    q = q_ref[0] * scale            # (tq, D) bf16; 1/sqrt(Dh) folded into q once, not per-head scores
    k = k_ref[0]                    # (tk, D) bf16
    v = v_ref[0]                    # (tk, D) bf16

    bias = pad_ref[0]               # (1, tk) f32 key-padding bias
    if mask_ref is not None:
        bias = mask_ref[...] + bias  # (tq, tk) additive attention mask (causal / user mask)

    dims = (((1,), (1,)), ((), ()))  # contract last dims: q @ k^T without materializing k.T
    for h in range(H):
        sl = slice(h * Dh, (h + 1) * Dh)
        s = jax.lax.dot_general(q[:, sl], k[:, sl], dims,
                                preferred_element_type=jnp.float32) + bias
        m_prev = m_ref[:, h:h + 1]
        m_new = jnp.maximum(m_prev, jnp.max(s, axis=-1, keepdims=True))
        alpha = jnp.exp(m_prev - m_new)
        p = jnp.exp(s - m_new)
        l_ref[:, h:h + 1] = alpha * l_ref[:, h:h + 1] + jnp.sum(p, axis=-1, keepdims=True)
        acc_ref[:, sl] = alpha * acc_ref[:, sl] + jnp.dot(
            p.astype(v.dtype), v[:, sl], preferred_element_type=jnp.float32)
        m_ref[:, h:h + 1] = m_new

    @pl.when(ki == pl.num_programs(2) - 1)
    def _():
        for h in range(H):
            sl = slice(h * Dh, (h + 1) * Dh)
            acc_ref[:, sl] = acc_ref[:, sl] * pl.reciprocal(l_ref[:, h:h + 1], approx=True)
        o_ref[0] = acc_ref[...].astype(o_ref.dtype)      # single lane-dense output store


# ---------------------------- Pallas wrappers ----------------------------

def pallas_linear(x, w, b, out_dtype=jnp.float32):
    M, K = x.shape
    Nout = w.shape[1]
    tm, tn, tk = _tile(M, 512), _tile(Nout, 512), _tile(K, 1024)
    grid = (M // tm, Nout // tn, K // tk)
    return pl.pallas_call(
        _matmul_kernel,
        out_shape=jax.ShapeDtypeStruct((M, Nout), out_dtype),
        grid=grid,
        in_specs=[pl.BlockSpec((tm, tk), lambda i, j, k: (i, k)),
                  pl.BlockSpec((tk, tn), lambda i, j, k: (k, j)),
                  pl.BlockSpec((1, tn), lambda i, j, k: (0, j))],
        out_specs=pl.BlockSpec((tm, tn), lambda i, j, k: (i, j)),
        scratch_shapes=[pltpu.VMEM((tm, tn), jnp.float32)],
        compiler_params=pltpu.CompilerParams(
            dimension_semantics=("parallel", "parallel", "arbitrary"),
            vmem_limit_bytes=VMEM_LIMIT),
    )(x, w.astype(jnp.bfloat16), b.reshape(1, Nout))


def pallas_fused_proj(x, ws, bs, out_dtype=jnp.bfloat16):
    """Several projections of the same x in one pallas_call (fused QKV / KV): returns a tuple."""
    M, K = x.shape
    Dout = ws[0].shape[1]
    n_out = len(ws)
    tm, tn, tk = _tile(M, 512), _tile(Dout, 256), _tile(K, 1024)
    grid = (M // tm, Dout // tn, K // tk)
    kernel = functools.partial(_fused_proj_kernel, n_out=n_out)
    x_spec = pl.BlockSpec((tm, tk), lambda i, j, k: (i, k))
    w_spec = pl.BlockSpec((tk, tn), lambda i, j, k: (k, j))
    b_spec = pl.BlockSpec((1, tn), lambda i, j, k: (0, j))
    o_spec = pl.BlockSpec((tm, tn), lambda i, j, k: (i, j))
    return pl.pallas_call(
        kernel,
        out_shape=tuple(jax.ShapeDtypeStruct((M, Dout), out_dtype) for _ in range(n_out)),
        grid=grid,
        in_specs=[x_spec] + [w_spec] * n_out + [b_spec] * n_out,
        out_specs=tuple(o_spec for _ in range(n_out)),
        scratch_shapes=[pltpu.VMEM((tm, tn), jnp.float32) for _ in range(n_out)],
        compiler_params=pltpu.CompilerParams(
            dimension_semantics=("parallel", "parallel", "arbitrary"),
            vmem_limit_bytes=VMEM_LIMIT),
    )(x, *[w.astype(jnp.bfloat16) for w in ws], *[b.reshape(1, Dout) for b in bs])


def pallas_linear_res_ln(x, w, b, residual, gamma, beta):
    """y = LayerNorm(x @ w + b + residual); LN over the full output row (no N-out tiling)."""
    M, K = x.shape
    D = w.shape[1]
    tm, tk = _tile(M, 512), _tile(K, 1024)
    grid = (M // tm, K // tk)
    return pl.pallas_call(
        _matmul_res_ln_kernel,
        out_shape=jax.ShapeDtypeStruct((M, D), jnp.float32),
        grid=grid,
        in_specs=[pl.BlockSpec((tm, tk), lambda i, k: (i, k)),
                  pl.BlockSpec((tk, D), lambda i, k: (k, 0)),
                  pl.BlockSpec((1, D), lambda i, k: (0, 0)),
                  pl.BlockSpec((tm, D), lambda i, k: (i, 0)),
                  pl.BlockSpec((1, D), lambda i, k: (0, 0)),
                  pl.BlockSpec((1, D), lambda i, k: (0, 0))],
        out_specs=pl.BlockSpec((tm, D), lambda i, k: (i, 0)),
        scratch_shapes=[pltpu.VMEM((tm, D), jnp.float32)],
        compiler_params=pltpu.CompilerParams(
            dimension_semantics=("parallel", "arbitrary"),
            vmem_limit_bytes=VMEM_LIMIT),
    )(x, w.astype(jnp.bfloat16), b.reshape(1, D), residual,
      gamma.reshape(1, D), beta.reshape(1, D))


def pallas_ffn_res_ln(x, w1, b1, w2, b2, gamma, beta):
    """Fused FFN block: LayerNorm(x + W2 relu(W1 x + b1) + b2) in one kernel."""
    M, D = x.shape
    FF = w1.shape[1]
    tm = _tile(M, 256)
    return pl.pallas_call(
        _ffn_res_ln_kernel,
        out_shape=jax.ShapeDtypeStruct((M, D), jnp.float32),
        grid=(M // tm,),
        in_specs=[pl.BlockSpec((tm, D), lambda i: (i, 0)),
                  pl.BlockSpec((D, FF), lambda i: (0, 0)),
                  pl.BlockSpec((1, FF), lambda i: (0, 0)),
                  pl.BlockSpec((FF, D), lambda i: (0, 0)),
                  pl.BlockSpec((1, D), lambda i: (0, 0)),
                  pl.BlockSpec((1, D), lambda i: (0, 0)),
                  pl.BlockSpec((1, D), lambda i: (0, 0))],
        out_specs=pl.BlockSpec((tm, D), lambda i: (i, 0)),
        compiler_params=pltpu.CompilerParams(
            dimension_semantics=("parallel",),
            vmem_limit_bytes=VMEM_LIMIT),
    )(x, w1.astype(jnp.bfloat16), b1.reshape(1, FF),
      w2.astype(jnp.bfloat16), b2.reshape(1, D),
      gamma.reshape(1, D), beta.reshape(1, D))


def pallas_layernorm(x, g, b):
    M, D = x.shape
    tm = _tile(M, 256)
    return pl.pallas_call(
        _layernorm_kernel,
        out_shape=jax.ShapeDtypeStruct((M, D), jnp.float32),
        grid=(M // tm,),
        in_specs=[pl.BlockSpec((tm, D), lambda i: (i, 0)),
                  pl.BlockSpec((1, D), lambda i: (0, 0)),
                  pl.BlockSpec((1, D), lambda i: (0, 0))],
        out_specs=pl.BlockSpec((tm, D), lambda i: (i, 0)),
        compiler_params=pltpu.CompilerParams(dimension_semantics=("parallel",),
                                             vmem_limit_bytes=VMEM_LIMIT),
    )(x, g.reshape(1, D), b.reshape(1, D))


def pallas_self_attention(q, k, v, mask, pad, H, D, scale):
    """q/k/v: (N, L, D) bf16; mask: (L, L) f32; pad: (N, 1, L) f32 -> (N, L, D) bf16."""
    N, L, _ = q.shape
    Dh = D // H
    tq, tk = _attn_tile(L), _attn_tile(L)
    grid = (N, L // tq, L // tk)
    kernel = functools.partial(_flash_attn_kernel, H=H, Dh=Dh, scale=scale, has_mask=True)
    return pl.pallas_call(
        kernel,
        out_shape=jax.ShapeDtypeStruct((N, L, D), jnp.bfloat16),
        grid=grid,
        in_specs=[pl.BlockSpec((1, tq, D), lambda n, qi, ki: (n, qi, 0)),
                  pl.BlockSpec((1, tk, D), lambda n, qi, ki: (n, ki, 0)),
                  pl.BlockSpec((1, tk, D), lambda n, qi, ki: (n, ki, 0)),
                  pl.BlockSpec((tq, tk), lambda n, qi, ki: (qi, ki)),
                  pl.BlockSpec((1, 1, tk), lambda n, qi, ki: (n, 0, ki))],
        out_specs=pl.BlockSpec((1, tq, D), lambda n, qi, ki: (n, qi, 0)),
        scratch_shapes=[pltpu.VMEM((tq, H), jnp.float32),
                        pltpu.VMEM((tq, H), jnp.float32),
                        pltpu.VMEM((tq, D), jnp.float32)],
        compiler_params=pltpu.CompilerParams(
            dimension_semantics=("parallel", "parallel", "arbitrary"),
            vmem_limit_bytes=VMEM_LIMIT),
    )(q, k, v, mask, pad)


def pallas_cross_attention(q, k, v, pad, H, D, scale):
    """q: (N, Lq, D); k/v: (N, Lk, D) bf16; pad: (N, 1, Lk) f32 -> (N, Lq, D) bf16."""
    N, Lq, _ = q.shape
    Lk = k.shape[1]
    Dh = D // H
    tq, tk = _attn_tile(Lq), _attn_tile(Lk)
    grid = (N, Lq // tq, Lk // tk)
    kernel = functools.partial(_flash_attn_kernel, H=H, Dh=Dh, scale=scale, has_mask=False)
    return pl.pallas_call(
        kernel,
        out_shape=jax.ShapeDtypeStruct((N, Lq, D), jnp.bfloat16),
        grid=grid,
        in_specs=[pl.BlockSpec((1, tq, D), lambda n, qi, ki: (n, qi, 0)),
                  pl.BlockSpec((1, tk, D), lambda n, qi, ki: (n, ki, 0)),
                  pl.BlockSpec((1, tk, D), lambda n, qi, ki: (n, ki, 0)),
                  pl.BlockSpec((1, 1, tk), lambda n, qi, ki: (n, 0, ki))],
        out_specs=pl.BlockSpec((1, tq, D), lambda n, qi, ki: (n, qi, 0)),
        scratch_shapes=[pltpu.VMEM((tq, H), jnp.float32),
                        pltpu.VMEM((tq, H), jnp.float32),
                        pltpu.VMEM((tq, D), jnp.float32)],
        compiler_params=pltpu.CompilerParams(
            dimension_semantics=("parallel", "parallel", "arbitrary"),
            vmem_limit_bytes=VMEM_LIMIT),
    )(q, k, v, pad)


# ---------------------------- model building blocks ----------------------------

def mha_self_block(x2d, p, mask, pad, H, N, L, D, ln):
    """x2d: (N*L, D) batch-first flat. Returns LayerNorm(x + SelfAttn(x)) as (N*L, D)."""
    scale = 1.0 / math.sqrt(D // H)
    q, k, v = pallas_fused_proj(x2d, [p['wq'], p['wk'], p['wv']],
                                [p['bq'], p['bk'], p['bv']])             # (N*L, D) bf16 each
    attn = pallas_self_attention(q.reshape(N, L, D), k.reshape(N, L, D), v.reshape(N, L, D),
                                 mask, pad, H, D, scale)                 # (N, L, D) bf16
    return pallas_linear_res_ln(attn.reshape(N * L, D), p['wo'], p['bo'],  # out-proj + add + LN
                                x2d, ln['g'], ln['b'])


def mha_cross_block(x2d, mem2d, p, pad, H, N, Lq, Lk, D, ln):
    """Returns LayerNorm(x + CrossAttn(x, mem)) as (N*Lq, D)."""
    scale = 1.0 / math.sqrt(D // H)
    q = pallas_linear(x2d, p['wq'], p['bq'], out_dtype=jnp.bfloat16)     # (N*Lq, D)
    k, v = pallas_fused_proj(mem2d, [p['wk'], p['wv']], [p['bk'], p['bv']])
    attn = pallas_cross_attention(q.reshape(N, Lq, D), k.reshape(N, Lk, D), v.reshape(N, Lk, D),
                                  pad, H, D, scale)
    return pallas_linear_res_ln(attn.reshape(N * Lq, D), p['wo'], p['bo'],
                                x2d, ln['g'], ln['b'])


def ffn_block(x2d, p, ln):
    return pallas_ffn_res_ln(x2d, p['w1'], p['b1'], p['w2'], p['b2'], ln['g'], ln['b'])


def encoder_layer(x2d, p, mask, pad, H, N, S, D):
    x2 = mha_self_block(x2d, p['sa'], mask, pad, H, N, S, D, p['ln1'])
    return ffn_block(x2, p['ff'], p['ln2'])


def decoder_layer(x2d, mem2d, p, self_mask, self_pad, mem_pad, H, N, T, S, D):
    x2 = mha_self_block(x2d, p['sa'], self_mask, self_pad, H, N, T, D, p['ln1'])
    x3 = mha_cross_block(x2, mem2d, p['ca'], mem_pad, H, N, T, S, D, p['ln2'])
    return ffn_block(x3, p['ff'], p['ln3'])


def detox_forward(params, src, trg, src_mask, trg_mask,
                  src_padding_mask, trg_padding_mask, memory_key_padding_mask, *, H):
    D = params['src_emb'].shape[1]
    S, N = src.shape
    T = trg.shape[0]
    pe = params['pos_emb']

    # TokenEmbedding * sqrt(D) + PositionalEncoding (dropout = identity).
    src_e = jnp.take(params['src_emb'], src, axis=0) * math.sqrt(D) + pe[:S]   # (S, N, D)
    trg_e = jnp.take(params['trg_emb'], trg, axis=0) * math.sqrt(D) + pe[:T]   # (T, N, D)

    # Batch-first internal layout.
    src_x = src_e.transpose(1, 0, 2).reshape(N * S, D)
    trg_x = trg_e.transpose(1, 0, 2).reshape(N * T, D)

    # Compact mask inputs: (Lq, Lk) head/batch-shared float mask + (N, 1, Lk) key-padding bias,
    # combined inside the attention kernel (no dense (N, Lq, Lk) bias through HBM).
    src_attn_mask = src_mask.astype(jnp.float32)
    trg_attn_mask = trg_mask.astype(jnp.float32)
    src_pad = jnp.where(src_padding_mask, NEG_INF, 0.0).astype(jnp.float32).reshape(N, 1, S)
    trg_pad = jnp.where(trg_padding_mask, NEG_INF, 0.0).astype(jnp.float32).reshape(N, 1, T)
    mem_pad = jnp.where(memory_key_padding_mask, NEG_INF, 0.0).astype(jnp.float32).reshape(N, 1, S)

    # encoder (+ final LayerNorm, as nn.Transformer does)
    x = src_x
    for lp in params['enc_layers']:
        x = encoder_layer(x, lp, src_attn_mask, src_pad, H, N, S, D)
    mem = pallas_layernorm(x, params['enc_norm']['g'], params['enc_norm']['b'])   # (N*S, D)

    # decoder (+ final LayerNorm); cross-attention uses memory_mask=None (key padding only)
    y = trg_x
    for lp in params['dec_layers']:
        y = decoder_layer(y, mem, lp, trg_attn_mask, trg_pad, mem_pad, H, N, T, S, D)
    y = pallas_layernorm(y, params['dec_norm']['g'], params['dec_norm']['b'])     # (N*T, D)

    # Generator: transpose the small D-wide activations to seq-first BEFORE the projection so the
    # (T*N, V) logits come out directly in (T, N, V) order (no transpose of the V-wide tensor).
    y_tn = y.reshape(N, T, D).transpose(1, 0, 2).reshape(T * N, D)
    V = params['gen_w'].shape[1]
    logits = pallas_linear(y_tn, params['gen_w'], params['gen_b'])                # (T*N, V)
    return logits.reshape(T, N, V)


# ---------------------------- deterministic parameter init ----------------------------

def init_params(key, num_enc, num_dec, D, H, V, FF, max_size):
    keys = iter(jax.random.split(key, 1024))

    def nrm(shape):
        return jax.random.normal(next(keys), shape, jnp.float32) * 0.02

    def zeros(n):
        return jnp.zeros((n,), jnp.float32)

    def attn_p():
        return dict(wq=nrm((D, D)), bq=zeros(D),
                    wk=nrm((D, D)), bk=zeros(D),
                    wv=nrm((D, D)), bv=zeros(D),
                    wo=nrm((D, D)), bo=zeros(D))

    def ln_p():
        return dict(g=jnp.ones((D,), jnp.float32), b=zeros(D))

    def ff_p():
        return dict(w1=nrm((D, FF)), b1=zeros(FF), w2=nrm((FF, D)), b2=zeros(D))

    enc_layers = [dict(sa=attn_p(), ln1=ln_p(), ln2=ln_p(), ff=ff_p())
                  for _ in range(num_enc)]
    dec_layers = [dict(sa=attn_p(), ca=attn_p(),
                       ln1=ln_p(), ln2=ln_p(), ln3=ln_p(), ff=ff_p())
                  for _ in range(num_dec)]

    # PositionalEncoding buffer, shape (max_size, 1, D) like the PyTorch module
    den = jnp.exp(-jnp.arange(0, D, 2, dtype=jnp.float32) * (math.log(10000.0) / D))
    pos = jnp.arange(max_size, dtype=jnp.float32).reshape(max_size, 1)
    pe = jnp.zeros((max_size, D), jnp.float32)
    pe = pe.at[:, 0::2].set(jnp.sin(pos * den))
    pe = pe.at[:, 1::2].set(jnp.cos(pos * den))
    pe = pe[:, None, :]

    return dict(src_emb=nrm((V, D)), trg_emb=nrm((V, D)),
                enc_layers=enc_layers, enc_norm=ln_p(),
                dec_layers=dec_layers, dec_norm=ln_p(),
                gen_w=nrm((D, V)), gen_b=zeros(V),
                pos_emb=pe)


# ---------------------------- main ----------------------------

if __name__ == "__main__":
    S, T, N = 8, 8, 2          # src len, trg len, batch
    D, H, V, FF = 32, 2, 64, 64
    NUM_ENC, NUM_DEC = 2, 2
    MAX_SIZE = 32

    key = jax.random.PRNGKey(0)
    pkey, skey, tkey = jax.random.split(key, 3)
    params = init_params(pkey, NUM_ENC, NUM_DEC, D, H, V, FF, MAX_SIZE)

    src = jax.random.randint(skey, (S, N), 0, V, dtype=jnp.int32)
    trg = jax.random.randint(tkey, (T, N), 0, V, dtype=jnp.int32)

    src_mask = jnp.zeros((S, S), jnp.float32)
    # causal mask like Transformer.generate_square_subsequent_mask (additive)
    trg_mask = jnp.where(jnp.triu(jnp.ones((T, T), jnp.float32), k=1) > 0, NEG_INF, 0.0)
    src_padding_mask = jnp.zeros((N, S), bool).at[1, S - 1].set(True)   # pad last src tok of batch 1
    trg_padding_mask = jnp.zeros((N, T), bool)
    memory_key_padding_mask = src_padding_mask

    out = detox_forward(params, src, trg, src_mask, trg_mask,
                        src_padding_mask, trg_padding_mask, memory_key_padding_mask, H=H)
    out = jax.block_until_ready(out)
    assert out.shape == (T, N, V) and out.dtype == jnp.float32
    assert bool(jnp.all(jnp.isfinite(out)))
    print("KERNEL_OK")
</pallas_src>

<mosaic_0001>
module attributes {stable_mosaic.version = 11 : i64} {
  func.func @_fused_proj_kernel(%arg0: i32, %arg1: i32, %arg2: i32, %arg3: memref<16x32xf32, #tpu.memory_space<vmem>>, %arg4: memref<32x32xbf16, #tpu.memory_space<vmem>>, %arg5: memref<32x32xbf16, #tpu.memory_space<vmem>>, %arg6: memref<32x32xbf16, #tpu.memory_space<vmem>>, %arg7: memref<1x32xf32, #tpu.memory_space<vmem>>, %arg8: memref<1x32xf32, #tpu.memory_space<vmem>>, %arg9: memref<1x32xf32, #tpu.memory_space<vmem>>, %arg10: memref<16x32xbf16, #tpu.memory_space<vmem>>, %arg11: memref<16x32xbf16, #tpu.memory_space<vmem>>, %arg12: memref<16x32xbf16, #tpu.memory_space<vmem>>, %arg13: memref<16x32xf32, #tpu.memory_space<vmem>>, %arg14: memref<16x32xf32, #tpu.memory_space<vmem>>, %arg15: memref<16x32xf32, #tpu.memory_space<vmem>>) attributes {dimension_semantics = [#tpu.dimension_semantics<parallel>, #tpu.dimension_semantics<parallel>, #tpu.dimension_semantics<arbitrary>], iteration_bounds = array<i64: 1, 1, 1>, scalar_prefetch = 0 : i64, scratch_operands = 3 : i64, tpu.core_type = #tpu.core_type<tc>, window_params = [{transform_indices = @transform_0, window_bounds = array<i64: 16, 32>}, {transform_indices = @transform_1, window_bounds = array<i64: 32, 32>}, {transform_indices = @transform_2, window_bounds = array<i64: 32, 32>}, {transform_indices = @transform_3, window_bounds = array<i64: 32, 32>}, {transform_indices = @transform_4, window_bounds = array<i64: 1, 32>}, {transform_indices = @transform_5, window_bounds = array<i64: 1, 32>}, {transform_indices = @transform_6, window_bounds = array<i64: 1, 32>}, {transform_indices = @transform_7, window_bounds = array<i64: 16, 32>}, {transform_indices = @transform_8, window_bounds = array<i64: 16, 32>}, {transform_indices = @transform_9, window_bounds = array<i64: 16, 32>}]} {
    %c0_i32 = arith.constant 0 : i32
    %0 = arith.cmpi eq, %arg2, %c0_i32 : i32
    %1 = arith.extui %0 : i1 to i32
    %c0_i32_0 = arith.constant 0 : i32
    %2 = arith.cmpi ne, %1, %c0_i32_0 : i32
    scf.if %2 {
      %cst_24 = arith.constant 0.000000e+00 : f32
      %23 = vector.broadcast %cst_24 : f32 to vector<16x32xf32>
      %c0_25 = arith.constant 0 : index
      %c0_26 = arith.constant 0 : index
      %24 = vector.load %arg13[%c0_25, %c0_26] : memref<16x32xf32, #tpu.memory_space<vmem>>, vector<16x32xf32>
      tpu.vector_store %arg13[%c0_25, %c0_26], %23 {strides = array<i32>} : memref<16x32xf32, #tpu.memory_space<vmem>>, vector<16x32xf32>,
      %cst_27 = arith.constant 0.000000e+00 : f32
      %25 = vector.broadcast %cst_27 : f32 to vector<16x32xf32>
      %c0_28 = arith.constant 0 : index
      %c0_29 = arith.constant 0 : index
      %26 = vector.load %arg14[%c0_28, %c0_29] : memref<16x32xf32, #tpu.memory_space<vmem>>, vector<16x32xf32>
      tpu.vector_store %arg14[%c0_28, %c0_29], %25 {strides = array<i32>} : memref<16x32xf32, #tpu.memory_space<vmem>>, vector<16x32xf32>,
      %cst_30 = arith.constant 0.000000e+00 : f32
      %27 = vector.broadcast %cst_30 : f32 to vector<16x32xf32>
      %c0_31 = arith.constant 0 : index
      %c0_32 = arith.constant 0 : index
      %28 = vector.load %arg15[%c0_31, %c0_32] : memref<16x32xf32, #tpu.memory_space<vmem>>, vector<16x32xf32>
      tpu.vector_store %arg15[%c0_31, %c0_32], %27 {strides = array<i32>} : memref<16x32xf32, #tpu.memory_space<vmem>>, vector<16x32xf32>,
    } else {
    }
    %c0 = arith.constant 0 : index
    %c0_1 = arith.constant 0 : index
    %3 = vector.load %arg3[%c0, %c0_1] : memref<16x32xf32, #tpu.memory_space<vmem>>, vector<16x32xf32>
    %4 = arith.truncf %3 : vector<16x32xf32> to vector<16x32xbf16>
    %c0_2 = arith.constant 0 : index
    %c0_3 = arith.constant 0 : index
    %5 = vector.load %arg13[%c0_2, %c0_3] : memref<16x32xf32, #tpu.memory_space<vmem>>, vector<16x32xf32>
    %c0_4 = arith.constant 0 : index
    %c0_5 = arith.constant 0 : index
    %6 = vector.load %arg4[%c0_4, %c0_5] : memref<32x32xbf16, #tpu.memory_space<vmem>>, vector<32x32xbf16>
    %cst = arith.constant dense<0.000000e+00> : vector<16x32xf32>
    %7 = tpu.matmul %4, %6, %cst {dimension_numbers = #tpu.dot_dimension_numbers<[1], [0], [0], [1], [0, 0, 1, 1], [], []>} : vector<16x32xbf16>, vector<32x32xbf16>, vector<16x32xf32> -> vector<16x32xf32>
    %8 = arith.addf %5, %7 : vector<16x32xf32>
    %c0_6 = arith.constant 0 : index
    %c0_7 = arith.constant 0 : index
    %9 = vector.load %arg13[%c0_6, %c0_7] : memref<16x32xf32, #tpu.memory_space<vmem>>, vector<16x32xf32>
    tpu.vector_store %arg13[%c0_6, %c0_7], %8 {strides = array<i32>} : memref<16x32xf32, #tpu.memory_space<vmem>>, vector<16x32xf32>,
    %c0_8 = arith.constant 0 : index
    %c0_9 = arith.constant 0 : index
    %10 = vector.load %arg14[%c0_8, %c0_9] : memref<16x32xf32, #tpu.memory_space<vmem>>, vector<16x32xf32>
    %c0_10 = arith.constant 0 : index
    %c0_11 = arith.constant 0 : index
    %11 = vector.load %arg5[%c0_10, %c0_11] : memref<32x32xbf16, #tpu.memory_space<vmem>>, vector<32x32xbf16>
    %cst_12 = arith.constant dense<0.000000e+00> : vector<16x32xf32>
    %12 = tpu.matmul %4, %11, %cst_12 {dimension_numbers = #tpu.dot_dimension_numbers<[1], [0], [0], [1], [0, 0, 1, 1], [], []>} : vector<16x32xbf16>, vector<32x32xbf16>, vector<16x32xf32> -> vector<16x32xf32>
    %13 = arith.addf %10, %12 : vector<16x32xf32>
    %c0_13 = arith.constant 0 : index
    %c0_14 = arith.constant 0 : index
    %14 = vector.load %arg14[%c0_13, %c0_14] : memref<16x32xf32, #tpu.memory_space<vmem>>, vector<16x32xf32>
    tpu.vector_store %arg14[%c0_13, %c0_14], %13 {strides = array<i32>} : memref<16x32xf32, #tpu.memory_space<vmem>>, vector<16x32xf32>,
    %c0_15 = arith.constant 0 : index
    %c0_16 = arith.constant 0 : index
    %15 = vector.load %arg15[%c0_15, %c0_16] : memref<16x32xf32, #tpu.memory_space<vmem>>, vector<16x32xf32>
    %c0_17 = arith.constant 0 : index
    %c0_18 = arith.constant 0 : index
    %16 = vector.load %arg6[%c0_17, %c0_18] : memref<32x32xbf16, #tpu.memory_space<vmem>>, vector<32x32xbf16>
    %cst_19 = arith.constant dense<0.000000e+00> : vector<16x32xf32>
    %17 = tpu.matmul %4, %16, %cst_19 {dimension_numbers = #tpu.dot_dimension_numbers<[1], [0], [0], [1], [0, 0, 1, 1], [], []>} : vector<16x32xbf16>, vector<32x32xbf16>, vector<16x32xf32> -> vector<16x32xf32>
    %18 = arith.addf %15, %17 : vector<16x32xf32>
    %c0_20 = arith.constant 0 : index
    %c0_21 = arith.constant 0 : index
    %19 = vector.load %arg15[%c0_20, %c0_21] : memref<16x32xf32, #tpu.memory_space<vmem>>, vector<16x32xf32>
    tpu.vector_store %arg15[%c0_20, %c0_21], %18 {strides = array<i32>} : memref<16x32xf32, #tpu.memory_space<vmem>>, vector<16x32xf32>,
    %c0_i32_22 = arith.constant 0 : i32
    %20 = arith.cmpi eq, %arg2, %c0_i32_22 : i32
    %21 = arith.extui %20 : i1 to i32
    %c0_i32_23 = arith.constant 0 : i32
    %22 = arith.cmpi ne, %21, %c0_i32_23 : i32
    scf.if %22 {
      %c0_24 = arith.constant 0 : index
      %c0_25 = arith.constant 0 : index
      %23 = vector.load %arg13[%c0_24, %c0_25] : memref<16x32xf32, #tpu.memory_space<vmem>>, vector<16x32xf32>
      %c0_26 = arith.constant 0 : index
      %c0_27 = arith.constant 0 : index
      %24 = vector.load %arg7[%c0_26, %c0_27] : memref<1x32xf32, #tpu.memory_space<vmem>>, vector<1x32xf32>
      %25 = vector.broadcast %24 : vector<1x32xf32> to vector<16x32xf32>
      %26 = arith.addf %23, %25 : vector<16x32xf32>
      %27 = arith.truncf %26 : vector<16x32xf32> to vector<16x32xbf16>
      %c0_28 = arith.constant 0 : index
      %c0_29 = arith.constant 0 : index
      %28 = vector.load %arg10[%c0_28, %c0_29] : memref<16x32xbf16, #tpu.memory_space<vmem>>, vector<16x32xbf16>
      tpu.vector_store %arg10[%c0_28, %c0_29], %27 {strides = array<i32>} : memref<16x32xbf16, #tpu.memory_space<vmem>>, vector<16x32xbf16>,
      %c0_30 = arith.constant 0 : index
      %c0_31 = arith.constant 0 : index
      %29 = vector.load %arg14[%c0_30, %c0_31] : memref<16x32xf32, #tpu.memory_space<vmem>>, vector<16x32xf32>
      %c0_32 = arith.constant 0 : index
      %c0_33 = arith.constant 0 : index
      %30 = vector.load %arg8[%c0_32, %c0_33] : memref<1x32xf32, #tpu.memory_space<vmem>>, vector<1x32xf32>
      %31 = vector.broadcast %30 : vector<1x32xf32> to vector<16x32xf32>
      %32 = arith.addf %29, %31 : vector<16x32xf32>
      %33 = arith.truncf %32 : vector<16x32xf32> to vector<16x32xbf16>
      %c0_34 = arith.constant 0 : index
      %c0_35 = arith.constant 0 : index
      %34 = vector.load %arg11[%c0_34, %c0_35] : memref<16x32xbf16, #tpu.memory_space<vmem>>, vector<16x32xbf16>
      tpu.vector_store %arg11[%c0_34, %c0_35], %33 {strides = array<i32>} : memref<16x32xbf16, #tpu.memory_space<vmem>>, vector<16x32xbf16>,
      %c0_36 = arith.constant 0 : index
      %c0_37 = arith.constant 0 : index
      %35 = vector.load %arg15[%c0_36, %c0_37] : memref<16x32xf32, #tpu.memory_space<vmem>>, vector<16x32xf32>
      %c0_38 = arith.constant 0 : index
      %c0_39 = arith.constant 0 : index
      %36 = vector.load %arg9[%c0_38, %c0_39] : memref<1x32xf32, #tpu.memory_space<vmem>>, vector<1x32xf32>
      %37 = vector.broadcast %36 : vector<1x32xf32> to vector<16x32xf32>
      %38 = arith.addf %35, %37 : vector<16x32xf32>
      %39 = arith.truncf %38 : vector<16x32xf32> to vector<16x32xbf16>
      %c0_40 = arith.constant 0 : index
      %c0_41 = arith.constant 0 : index
      %40 = vector.load %arg12[%c0_40, %c0_41] : memref<16x32xbf16, #tpu.memory_space<vmem>>, vector<16x32xbf16>
      tpu.vector_store %arg12[%c0_40, %c0_41], %39 {strides = array<i32>} : memref<16x32xbf16, #tpu.memory_space<vmem>>, vector<16x32xbf16>,
    } else {
    }
    return
  }
  func.func @transform_0(%arg0: i32, %arg1: i32, %arg2: i32) -> (i32, i32) {
    %c0_i32 = arith.constant 0 : i32
    return %arg0, %arg2 : i32, i32
  }
  func.func @transform_1(%arg0: i32, %arg1: i32, %arg2: i32) -> (i32, i32) {
    %c0_i32 = arith.constant 0 : i32
    return %arg2, %arg1 : i32, i32
  }
  func.func @transform_2(%arg0: i32, %arg1: i32, %arg2: i32) -> (i32, i32) {
    %c0_i32 = arith.constant 0 : i32
    return %arg2, %arg1 : i32, i32
  }
  func.func @transform_3(%arg0: i32, %arg1: i32, %arg2: i32) -> (i32, i32) {
    %c0_i32 = arith.constant 0 : i32
    return %arg2, %arg1 : i32, i32
  }
  func.func @transform_4(%arg0: i32, %arg1: i32, %arg2: i32) -> (i32, i32) {
    %c0_i32 = arith.constant 0 : i32
    %c0_i32_0 = arith.constant 0 : i32
    return %c0_i32, %arg1 : i32, i32
  }
  func.func @transform_5(%arg0: i32, %arg1: i32, %arg2: i32) -> (i32, i32) {
    %c0_i32 = arith.constant 0 : i32
    %c0_i32_0 = arith.constant 0 : i32
    return %c0_i32, %arg1 : i32, i32
  }
  func.func @transform_6(%arg0: i32, %arg1: i32, %arg2: i32) -> (i32, i32) {
    %c0_i32 = arith.constant 0 : i32
    %c0_i32_0 = arith.constant 0 : i32
    return %c0_i32, %arg1 : i32, i32
  }
  func.func @transform_7(%arg0: i32, %arg1: i32, %arg2: i32) -> (i32, i32) {
    %c0_i32 = arith.constant 0 : i32
    return %arg0, %arg1 : i32, i32
  }
  func.func @transform_8(%arg0: i32, %arg1: i32, %arg2: i32) -> (i32, i32) {
    %c0_i32 = arith.constant 0 : i32
    return %arg0, %arg1 : i32, i32
  }
  func.func @transform_9(%arg0: i32, %arg1: i32, %arg2: i32) -> (i32, i32) {
    %c0_i32 = arith.constant 0 : i32
    return %arg0, %arg1 : i32, i32
  }
}

</mosaic_0001>

<bundles_post_ra>
// kernel: tpu_custom_call.1
= control target key start
LH: loop header
LB: loop body
LE: loop exit
PB: predicated region body
PF: predicated region fallthrough
CT: control target
= control target key end

     0   :  { %15 = vsyncpa [#allocation6], 0  ;;  %s772_s0 = inlined_call_operand.hbm [shape: f32[16,32], index: 0, kind: input, shape index: {}]   ;;  %s773_s1 = inlined_call_operand.hbm [shape: bf16[32,32], index: 1, kind: input, shape index: {}]   ;;  %s774_s2 = inlined_call_operand.hbm [shape: bf16[32,32], index: 2, kind: input, shape index: {}]   ;;  %s775_s3 = inlined_call_operand.hbm [shape: bf16[32,32], index: 3, kind: input, shape index: {}]   ;;  %s776_s4 = inlined_call_operand.vmem [shape: f32[1,32], index: 4, kind: input, shape index: {}]   ;;  %s777_s5 = inlined_call_operand.vmem [shape: f32[1,32], index: 5, kind: input, shape index: {}]   ;;  %s778_s6 = inlined_call_operand.vmem [shape: f32[1,32], index: 6, kind: input, shape index: {}]   ;;  %s779_s7 = inlined_call_operand.hbm [shape: bf16[16,32], index: 7, kind: output, shape index: {0}]   ;;  %s780_s8 = inlined_call_operand.hbm [shape: bf16[16,32], index: 8, kind: output, shape index: {1}]   ;;  %s781_s9 = inlined_call_operand.hbm [shape: bf16[16,32], index: 9, kind: output, shape index: {2}]  }
   0x1   :  { %16 = vsyncpa [#allocation9], 0 }
   0x2   :  { %17 = vsyncpa [#allocation12], 0 }
   0x3   :  { %18 = vsyncpa [#allocation7], 0 }
   0x4   :  { %19 = vsyncpa [#allocation15], 0  ;;  %s637_s30 = smov [#allocation8]  }
   0x5   :  { %s37_s10 = sshll.u32 %s637_s30, 4  ;;  %s38_s10 = int_to_ptr.vmem [resolvable:$true] %s37_s10 }
   0x6   :  { %s495_s11 = scalar_lea.vmem %s38_s10, 256  ;;  %p500_p1 = scmp.lt.s32.totalorder %s38_s10, %s38_s10 }
   0x7   :  { %p496_p0 = scmp.ne.s32.totalorder %s38_s10, %s495_s11  ;;  %p501_p2 = scmp.lt.s32.totalorder %s495_s11, %s495_s11 }
   0x9   :  { %p502_p3 = por %p501_p2, %p500_p1 }
   0xb   :  { %p503_p4 = pnand %p502_p3, %p496_p0 }
   0xd   :  { %506 = shalt.err (!%p503_p4)
}
   0xe   :  { %s638_s12 = smov 64   ;;  %s639_s13 = smov 4  }
   0xf   :  { %43 = dma.hbm_to_vmem [thread:$0]  %s773_s1, 256, %s38_s10, [#allocation9], %s638_s12, %s638_s12, %s639_s13  }
  0x10   :  { %s640_s16 = smov [#allocation5]  }
  0x11   :  { %s25_s17 = sshll.u32 %s640_s16, 4  ;;  %s26_s17 = int_to_ptr.vmem [resolvable:$true] %s25_s17 }
  0x12   :  { %s515_s18 = scalar_lea.vmem %s26_s17, 256  ;;  %p520_p6 = scmp.lt.s32.totalorder %s26_s17, %s26_s17 }
  0x13   :  { %p516_p5 = scmp.ne.s32.totalorder %s26_s17, %s515_s18  ;;  %p521_p7 = scmp.lt.s32.totalorder %s515_s18, %s515_s18 }
  0x15   :  { %p522_p8 = por %p521_p7, %p520_p6 }
  0x17   :  { %p523_p9 = pnand %p522_p8, %p516_p5 }
  0x19   :  { %526 = shalt.err (!%p523_p9)
}
  0x1a   :  { %s641_s19 = smov 128   ;;  %s642_s20 = smov 8  }
  0x1b   :  { %31 = dma.hbm_to_vmem [thread:$0]  %s772_s0, 256, %s26_s17, [#allocation6], %s641_s19, %s641_s19, %s642_s20  }
  0x1c   :  { %s643_s23 = smov [#allocation10]   ;;  %s644_s25 = smov [#allocation11]  }
  0x1d   :  { %s49_s24 = sshll.u32 %s643_s23, 4  ;;  %s61_s1 = sshll.u32 %s644_s25, 4  ;;  %s50_s24 = int_to_ptr.vmem [resolvable:$true] %s49_s24  ;;  %s62_s1 = int_to_ptr.vmem [resolvable:$true] %s61_s1 }
  0x1e   :  { %s535_s26 = scalar_lea.vmem %s50_s24, 256  ;;  %p540_p11 = scmp.lt.s32.totalorder %s50_s24, %s50_s24 }
  0x1f   :  { %p536_p10 = scmp.ne.s32.totalorder %s50_s24, %s535_s26  ;;  %p541_p12 = scmp.lt.s32.totalorder %s535_s26, %s535_s26 }
  0x21   :  { %p542_p13 = por %p541_p12, %p540_p11 }
  0x23   :  { %p543_p0 = pnand %p542_p13, %p536_p10 }
  0x25   :  { %546 = shalt.err (!%p543_p0)
}
  0x26   :  { %55 = dma.hbm_to_vmem [thread:$0]  %s774_s2, 256, %s50_s24, [#allocation9], %s638_s12, %s638_s12, %s639_s13  }
  0x27   :  { %s555_s0 = scalar_lea.vmem %s62_s1, 256  ;;  %p560_p2 = scmp.lt.s32.totalorder %s62_s1, %s62_s1 }
  0x28   :  { %p556_p1 = scmp.ne.s32.totalorder %s62_s1, %s555_s0  ;;  %p561_p3 = scmp.lt.s32.totalorder %s555_s0, %s555_s0 }
  0x2a   :  { %p562_p4 = por %p561_p3, %p560_p2 }
  0x2c   :  { %p563_p5 = pnand %p562_p4, %p556_p1 }
  0x2e   :  { %566 = shalt.err (!%p563_p5)
}
  0x2f   :  { %67 = dma.hbm_to_vmem [thread:$0]  %s775_s3, 256, %s62_s1, [#allocation12], %s638_s12, %s638_s12, %s639_s13  }
  0x30   :  { %627 = dma.done.wait [#allocation6], 256  }
  0x31   :  { %628 = vsyncadd [#allocation6], 4294967040 }
  0x32   :  { %629 = dma.done.wait [#allocation9], 512  }
  0x33   :  { %630 = vsyncadd [#allocation9], 4294966784 }
  0x34   :  { %631 = dma.done.wait [#allocation12], 256  }
  0x35   :  { %632 = vsyncadd [#allocation12], 4294967040  ;;  %vm91_vm0 = vcmask 261120   ;;  %v645_v0 = vmov 0.0   ;;  %vm646_vm1 = vmmov 0   ;;  %v481_v1 = vld [vmem:[#allocation8 + $0x8] sm:$0xff]  }
  0x36   :  { %444 = vmatprep.subr.bf16.mxu0 %v645_v0  ;;  %452 = vmatprep.subr.bf16.mxu1 %v645_v0  ;;  %92 = vst.msk [vmem:[#allocation2] sm:$0xff] %vm91_vm0, %v645_v0  ;;  %93 = vst.msk [vmem:[#allocation2 + $0x8] sm:$0xff] %vm91_vm0, %v645_v0  ;;  %v482_v2 = vld [vmem:[#allocation10 + $0x8] sm:$0xff]   ;;  %v483_v3 = vld [vmem:[#allocation8] sm:$0xff]   ;;  %vm316_vm2 = vcmask 257024  }
  0x37   :  { %94 = vst.msk [vmem:[#allocation3] sm:$0xff] %vm91_vm0, %v645_v0  ;;  %95 = vst.msk [vmem:[#allocation3 + $0x8] sm:$0xff] %vm91_vm0, %v645_v0  ;;  %448 = vmatprep.mubr.msk.bf16.mxu0 %vm646_vm1, %v645_v0  ;;  %456 = vmatprep.mubr.msk.bf16.mxu1 %vm646_vm1, %v645_v0  ;;  %v484_v4 = vld [vmem:[#allocation10] sm:$0xff]   ;;  %v99_v6 = vld [vmem:[#allocation5 + $0x8] sm:$0xff] }
  0x38   :  { %96 = vst.msk [vmem:[#allocation4] sm:$0xff] %vm91_vm0, %v645_v0  ;;  %97 = vst.msk [vmem:[#allocation4 + $0x8] sm:$0xff] %vm91_vm0, %v645_v0  ;;  %445 = vmatpush3.bf16.msra.mxu0 %v481_v1  ;;  %453 = vmatpush3.bf16.msra.mxu1 %v482_v2  ;;  %v98_v5 = vld [vmem:[#allocation5] sm:$0xff]  ;;  %v485_v8 = vld [vmem:[#allocation11 + $0x8] sm:$0xff]  }
  0x39   :  { %446 = vmatprep.subr.bf16.mxu0 %v645_v0  ;;  %454 = vmatprep.subr.bf16.mxu1 %v645_v0  ;;  %v100_v7 = vpack.c.bf16 %v99_v6, %v98_v5  ;;  %v486_v9 = vld [vmem:[#allocation11] sm:$0xff]  }
  0x3a   :  { %v420_v28 = vld [vmem:[%s776_s4] ss:$0 sm:$0xff]  ;;  %s647_s4 = smov [#allocation13]  }
  0x3b   :  { %v423_v30 = vld [vmem:[%s777_s5] ss:$0 sm:$0xff]  ;;  %s366_s14 = sshll.u32 %s647_s4, 4  ;;  %s648_s5 = smov [#allocation14]   ;;  %s367_s14 = int_to_ptr.vmem [resolvable:$true] %s366_s14 }
  0x3c   :  { %447 = vmatpush3.bf16.msra.mxu0 %v483_v3  ;;  %455 = vmatpush3.bf16.msra.mxu1 %v484_v4  ;;  %s378_s15 = sshll.u32 %s648_s5, 4  ;;  %v426_v46 = vld [vmem:[%s778_s6] ss:$0 sm:$0xff]  ;;  %s567_s18 = scalar_lea.vmem %s367_s14, 128  ;;  %s379_s15 = int_to_ptr.vmem [resolvable:$true] %s378_s15 }
  0x3d   :  { %460 = vmatprep.subr.bf16.mxu0 %v645_v0  ;;  %v101_v10 = vld [vmem:[#allocation2] sm:$0xff]  ;;  %v102_v17 = vld [vmem:[#allocation2 + $0x8] sm:$0xff]  ;;  %p568_p6 = scmp.ne.s32.totalorder %s367_s14, %s567_s18  ;;  %p572_p7 = scmp.lt.s32.totalorder %s367_s14, %s367_s14 }
  0x3e   :  { %v168_v11 = vld [vmem:[#allocation3] sm:$0xff]  ;;  %v169_v19 = vld [vmem:[#allocation3 + $0x8] sm:$0xff]  ;;  %p573_p8 = scmp.lt.s32.totalorder %s567_s18, %s567_s18 }
  0x3f   :  { %449 = vmatmul.mubr.msk.bf16.vlgmr.msra.gmra.mxu0 %vm91_vm0, %v100_v7  ;;  %457 = vmatmul.mubr.msk.bf16.vlgmr.msra.gmra.mxu1 %vm91_vm0, %v100_v7  ;;  %v231_v25 = vld [vmem:[#allocation4] sm:$0xff]  ;;  %v232_v32 = vld [vmem:[#allocation4 + $0x8] sm:$0xff] }
  0x40   :  { %461 = vmatpush3.bf16.msra.mxu0 %v485_v8  ;;  %464 = vmatprep.mubr.msk.bf16.mxu0 %vm646_vm1, %v645_v0  ;;  %p574_p9 = por %p573_p8, %p572_p7 }
  0x41   :  { %462 = vmatprep.subr.bf16.mxu0 %v645_v0 }
  0x42   :  { %p575_p10 = pnand %p574_p9, %p568_p6 }
  0x44   :  { %463 = vmatpush3.bf16.msra.mxu0 %v486_v9 }
  0x47   :  { %465 = vmatmul.mubr.msk.bf16.vlgmr.msra.gmra.mxu0 %vm91_vm0, %v100_v7 }
  0xff   :  { %v157_v12 = vpop.f32.mrf.mxu0  ;;  %v220_v14 = vpop.f32.mrf.mxu1 }
 0x100   :  { %v164_v13 = vadd.f32 %v157_v12, %v101_v10  ;;  %v227_v16 = vadd.f32 %v220_v14, %v168_v11 }
 0x101   :  { %v450_v15 = vpop.f32.mrf.mxu0  ;;  %v458_v18 = vpop.f32.mrf.mxu1 }
 0x102   :  { %166 = vst.msk [vmem:[#allocation2] sm:$0xff] %vm91_vm0, %v164_v13  ;;  %229 = vst.msk [vmem:[#allocation3] sm:$0xff] %vm91_vm0, %v227_v16 }
 0x103   :  { %v160_v20 = vpop.f32.mrf.mxu0  ;;  %v223_v22 = vpop.f32.mrf.mxu1 }
 0x104   :  { %v165_v21 = vadd.f32 %v160_v20, %v102_v17  ;;  %v228_v24 = vadd.f32 %v223_v22, %v169_v19 }
 0x105   :  { %v451_v23 = vpop.f32.mrf.mxu0  ;;  %v459_v26 = vpop.f32.mrf.mxu1 }
 0x106   :  { %167 = vst.msk [vmem:[#allocation2 + $0x8] sm:$0xff] %vm91_vm0, %v165_v21  ;;  %230 = vst.msk [vmem:[#allocation3 + $0x8] sm:$0xff] %vm91_vm0, %v228_v24 }
 0x107   :  { %v283_v27 = vpop.f32.mrf.mxu0 }
 0x108   :  { %v290_v29 = vadd.f32 %v283_v27, %v231_v25 }
 0x109   :  { %v466_v31 = vpop.f32.mrf.mxu0  ;;  %v297_v33 = vld [vmem:[#allocation2] sm:$0xff]  ;;  %v319_v34 = vld [vmem:[#allocation3] sm:$0xff] }
 0x10a   :  { %292 = vst.msk [vmem:[#allocation4] sm:$0xff] %vm91_vm0, %v290_v29  ;;  %v306_v35 = vadd.f32 %v420_v28, %v297_v33  ;;  %v328_v37 = vadd.f32 %v423_v30, %v319_v34 }
 0x10b   :  { %v286_v36 = vpop.f32.mrf.mxu0 }
 0x10c   :  { %v291_v38 = vadd.f32 %v286_v36, %v232_v32  ;;  %v429_v39 = vpack.c.bf16 %v306_v35, %v306_v35  ;;  %v431_v41 = vpack.c.bf16 %v328_v37, %v328_v37 }
 0x10d   :  { %v467_v40 = vpop.f32.mrf.mxu0  ;;  %v298_v42 = vld [vmem:[#allocation2 + $0x8] sm:$0xff]  ;;  %v320_v43 = vld [vmem:[#allocation3 + $0x8] sm:$0xff] }
 0x10e   :  { %293 = vst.msk [vmem:[#allocation4 + $0x8] sm:$0xff] %vm91_vm0, %v291_v38  ;;  %v307_v44 = vadd.f32 %v420_v28, %v298_v42  ;;  %v329_v45 = vadd.f32 %v423_v30, %v320_v43 }
 0x10f   :  { %317 = vst.msk [vmem:[#allocation13] sm:$0xf] %vm316_vm2, %v429_v39  ;;  %338 = vst.msk [vmem:[#allocation14] sm:$0xf] %vm316_vm2, %v431_v41 }
 0x110   :  { %v430_v47 = vpack.c.bf16 %v307_v44, %v307_v44  ;;  %v432_v48 = vpack.c.bf16 %v329_v45, %v329_v45 }
 0x111   :  { %v340_v49 = vld [vmem:[#allocation4] sm:$0xff] }
 0x112   :  { %318 = vst.msk [vmem:[#allocation13 + $0x4] sm:$0xf] %vm316_vm2, %v430_v47  ;;  %v349_v50 = vadd.f32 %v426_v46, %v340_v49  ;;  %339 = vst.msk [vmem:[#allocation14 + $0x4] sm:$0xf] %vm316_vm2, %v432_v48 }
 0x113   :  { %578 = shalt.err (!%p575_p10)
}
 0x114   :  { %372 = dma.vmem_to_hbm [thread:$0]  %s367_s14, 128, %s779_s7, [#allocation7], %s638_s12, %s638_s12, %s639_s13  }
 0x115   :  { %s587_s20 = scalar_lea.vmem %s379_s15, 128  ;;  %p592_p12 = scmp.lt.s32.totalorder %s379_s15, %s379_s15 }
 0x116   :  { %p588_p11 = scmp.ne.s32.totalorder %s379_s15, %s587_s20  ;;  %p593_p13 = scmp.lt.s32.totalorder %s587_s20, %s587_s20 }
 0x118   :  { %p594_p0 = por %p593_p13, %p592_p12 }
 0x11a   :  { %p595_p1 = pnand %p594_p0, %p588_p11 }
 0x11c   :  { %598 = shalt.err (!%p595_p1)
}
 0x11d   :  { %384 = dma.vmem_to_hbm [thread:$0]  %s379_s15, 128, %s780_s8, [#allocation15], %s638_s12, %s638_s12, %s639_s13   ;;  %v433_v51 = vpack.c.bf16 %v349_v50, %v349_v50  ;;  %v341_v52 = vld [vmem:[#allocation4 + $0x8] sm:$0xff] }
 0x11e   :  { %s649_s23 = smov [#allocation16]   ;;  %v350_v53 = vadd.f32 %v426_v46, %v341_v52 }
 0x11f   :  { %s390_s24 = sshll.u32 %s649_s23, 4  ;;  %359 = vst.msk [vmem:[#allocation16] sm:$0xf] %vm316_vm2, %v433_v51  ;;  %s391_s24 = int_to_ptr.vmem [resolvable:$true] %s390_s24 }
 0x120   :  { %v434_v54 = vpack.c.bf16 %v350_v53, %v350_v53  ;;  %s607_s7 = scalar_lea.vmem %s391_s24, 128  ;;  %p612_p3 = scmp.lt.s32.totalorder %s391_s24, %s391_s24 }
 0x121   :  { %p608_p2 = scmp.ne.s32.totalorder %s391_s24, %s607_s7  ;;  %p613_p4 = scmp.lt.s32.totalorder %s607_s7, %s607_s7 }
 0x122   :  { %360 = vst.msk [vmem:[#allocation16 + $0x4] sm:$0xf] %vm316_vm2, %v434_v54 }
 0x123   :  { %p614_p5 = por %p613_p4, %p612_p3 }
 0x125   :  { %p615_p6 = pnand %p614_p5, %p608_p2 }
 0x127   :  { %618 = shalt.err (!%p615_p6)
}
 0x128   :  { %396 = dma.vmem_to_hbm [thread:$0]  %s391_s24, 128, %s781_s9, [#allocation15], %s638_s12, %s638_s12, %s639_s13  }
 0x129   :  { %633 = dma.done.wait [#allocation7], 128  }
 0x12a   :  { %634 = vsyncadd [#allocation7], 4294967168 }
 0x12b   :  { %635 = dma.done.wait [#allocation15], 256  }
 0x12c   :  { %636 = vsyncadd [#allocation15], 4294967040 }
 0x12d   :  { %406 = vsyncpa [#allocation6], 1 }
 0x12e   :  { %407 = vsyncpa [#allocation9], 1 }
 0x12f   :  { %408 = vsyncpa [#allocation12], 1 }
 0x130   :  { %409 = vsyncpa [#allocation7], 1 }
 0x131   :  { %410 = vsyncpa [#allocation15], 1 }

</bundles_post_ra>
